<compile_context>
chip_gen: v5e
topology: v5e:2x2
jax: 0.10.0
libtpu: 0.0.40
codegen_flags: <defaults>
</compile_context>

<pallas_src>
import jax
import jax.numpy as jnp
from jax.experimental import pallas as pl
from jax.experimental.pallas import tpu as pltpu

_LANES = 128
_SUBLANES = 8
_TILE = _LANES * _SUBLANES  # bits per full f32 vreg tile (8 x 128)


def _ascii_bits_kernel(codes_ref, bits_ref):
    """codes_ref: (R, 128) int32; the element at flat index i holds the ASCII code of
    byte i // 8 (repeated x8 host-side, 0 in the padded tail).
    bits_ref:  (R, 128) float32; flat MSB-first bit i lands at [i // 128, i % 128],
    so a row-major reshape of the output is already the final bit vector."""
    lane = jax.lax.broadcasted_iota(jnp.int32, bits_ref.shape, 1)
    # 128 % 8 == 0, so (row * 128 + lane) & 7 == lane & 7: per-lane bit position.
    shift = 7 - (lane & 7)
    bits_ref[...] = ((codes_ref[...] >> shift) & 1).astype(jnp.float32)


def ascii_codes_to_bits(codes_rep_2d, n_bits):
    """codes_rep_2d: (R, 128) int32 byte codes repeated x8 (already space-padded and
    zero-padded to a multiple of 1024 entries). Returns the (n_bits,) float32 bits."""
    rows, lanes = codes_rep_2d.shape
    n_pad = rows * lanes
    bits = pl.pallas_call(
        _ascii_bits_kernel,
        out_shape=jax.ShapeDtypeStruct((rows, lanes), jnp.float32),
        in_specs=[pl.BlockSpec(memory_space=pltpu.MemorySpace.VMEM)],
        out_specs=pl.BlockSpec(memory_space=pltpu.MemorySpace.VMEM),
    )(codes_rep_2d)
    flat = bits.reshape(n_pad)          # row-major: already the flat MSB-first order
    if n_pad > n_bits:
        flat = flat[:n_bits]            # drop vreg-alignment padding (zeros)
    return flat


class StringAsciiToTensorPallas:
    """Mirrors StringAsciiToTensor: string -> (n_bits,) float32 0/1 tensor."""

    def __init__(self, n_bits):
        self.n_bits = n_bits

    def __call__(self, input_string):
        return self.forward(input_string)

    def forward(self, input_string):
        assert 8 * len(input_string) <= self.n_bits, (
            "The number of characters should be not greater than {}.".format(
                int(self.n_bits / 8)))
        n_bytes = self.n_bits // 8
        if n_bytes == 0:
            return jnp.zeros((self.n_bits,), jnp.float32)
        # TODO(synk): ord()-based string parsing is host-side Python; no Pallas equivalent.
        codes = [ord(c) for c in input_string]
        codes += [0b00100000] * (n_bytes - len(codes))   # pad whole bytes with ' '
        # Repeat each byte code x8 (one entry per output bit) and zero-pad up to a
        # multiple of one (8, 128) f32 vreg tile -> kernel writes full unmasked vregs.
        n_pad = ((self.n_bits + _TILE - 1) // _TILE) * _TILE
        rep = [c for c in codes for _ in range(8)]
        rep += [0] * (n_pad - len(rep))                  # trailing zero bits + alignment
        codes_2d = jnp.asarray(rep, dtype=jnp.int32).reshape(n_pad // _LANES, _LANES)
        return ascii_codes_to_bits(codes_2d, self.n_bits)

    @staticmethod
    def reverse(bit_tensor):
        # TODO(synk): chr()/join string reconstruction is host-side Python; no Pallas equivalent.
        bit_list = [int(round(float(b))) for b in jax.device_get(bit_tensor).tolist()]
        characters = []
        for i in range(0, len(bit_list), 8):
            byte = bit_list[i:i + 8]
            if len(byte) < 8:
                break
            characters.append(chr(int("".join(map(str, byte)), 2)))
        return "".join(characters)


def _reference_bits(input_string, n_bits):
    """Pure-Python replica of the PyTorch module's forward logic."""
    flattened = "".join(format(ord(c), "08b") for c in input_string)
    assert len(flattened) <= n_bits
    bit_list = [int(b) for b in flattened]
    while n_bits - len(bit_list) >= 8:
        bit_list.extend([0, 0, 1, 0, 0, 0, 0, 0])
    if len(bit_list) < n_bits:
        bit_list += [0] * (n_bits - len(bit_list))
    return jnp.array(bit_list, dtype=jnp.float32)


if __name__ == "__main__":
    key = jax.random.PRNGKey(0)

    n_bits = 1024                         # capacity for 128 ASCII characters
    module = StringAsciiToTensorPallas(n_bits)

    # Deterministic synthetic message: 16 printable non-space chars from PRNGKey(0).
    char_codes = jax.random.randint(key, (16,), 33, 127)
    message = "".join(chr(int(c)) for c in jax.device_get(char_codes))

    bit_tensor = module(message)
    bit_tensor = jax.block_until_ready(bit_tensor)

    # Cross-check against the pure-Python reference of the original module.
    ref = _reference_bits(message, n_bits)
    assert bit_tensor.shape == (n_bits,)
    assert bit_tensor.dtype == jnp.float32
    assert jnp.array_equal(bit_tensor, ref)

    # Round-trip via reverse(): original message followed by space padding.
    recovered = StringAsciiToTensorPallas.reverse(bit_tensor)
    assert recovered == message + " " * (n_bits // 8 - len(message))

    print("KERNEL_OK")
</pallas_src>

<mosaic_0001>
module attributes {stable_mosaic.version = 11 : i64} {
  func.func @_ascii_bits_kernel(%arg0: memref<8x128xi32, #tpu.memory_space<vmem>>, %arg1: memref<8x128xf32, #tpu.memory_space<vmem>>) attributes {dimension_semantics = [], scalar_prefetch = 0 : i64, scratch_operands = 0 : i64, tpu.core_type = #tpu.core_type<tc>} {
    %0 = tpu.iota {dimensions = array<i32: 1>} : vector<8x128xi32>
    %c7_i32 = arith.constant 7 : i32
    %1 = vector.broadcast %c7_i32 : i32 to vector<8x128xi32>
    %2 = arith.andi %0, %1 : vector<8x128xi32>
    %c7_i32_0 = arith.constant 7 : i32
    %3 = vector.broadcast %c7_i32_0 : i32 to vector<8x128xi32>
    %4 = arith.subi %3, %2 : vector<8x128xi32>
    %c0 = arith.constant 0 : index
    %c0_1 = arith.constant 0 : index
    %5 = vector.load %arg0[%c0, %c0_1] : memref<8x128xi32, #tpu.memory_space<vmem>>, vector<8x128xi32>
    %6 = arith.shrsi %5, %4 : vector<8x128xi32>
    %c1_i32 = arith.constant 1 : i32
    %7 = vector.broadcast %c1_i32 : i32 to vector<8x128xi32>
    %8 = arith.andi %6, %7 : vector<8x128xi32>
    %9 = arith.sitofp %8 : vector<8x128xi32> to vector<8x128xf32>
    %c0_2 = arith.constant 0 : index
    %c0_3 = arith.constant 0 : index
    %10 = vector.load %arg1[%c0_2, %c0_3] : memref<8x128xf32, #tpu.memory_space<vmem>>, vector<8x128xf32>
    tpu.vector_store %arg1[%c0_2, %c0_3], %9 {strides = array<i32>} : memref<8x128xf32, #tpu.memory_space<vmem>>, vector<8x128xf32>,
    return
  }
}

</mosaic_0001>

<bundles_post_ra>
// kernel: tpu_custom_call.1
= control target key start
LH: loop header
LB: loop body
LE: loop exit
PB: predicated region body
PF: predicated region fallthrough
CT: control target
= control target key end

     0   :  { %6 = vsyncpa [#allocation3], 0  ;;  %s121_s0 = inlined_call_operand.hbm [shape: s32[8,128], index: 0, kind: input, shape index: {}]   ;;  %s122_s1 = inlined_call_operand.hbm [shape: f32[8,128], index: 1, kind: output, shape index: {}]  }
   0x1   :  { %7 = vsyncpa [#allocation4], 0  ;;  %s13_s8 = sshll.u32 %s121_s0, 4  ;;  %s103_s9 = smov [#allocation2]   ;;  %s14_s8 = int_to_ptr.hbm [resolvable:$true] %s13_s8 }
   0x2   :  { %s15_s10 = sshll.u32 %s103_s9, 4  ;;  %s16_s10 = int_to_ptr.vmem [resolvable:$true] %s15_s10 }
   0x3   :  { %18 = dma.hbm_to_vmem [thread:$0]  %s14_s8, 128, %s16_s10, [#allocation3]  }
   0x4   :  { %99 = dma.done.wait [#allocation3], 128  }
   0x5   :  { %100 = vsyncadd [#allocation3], 4294967168  ;;  %v23_v0 = vlaneseq  ;;  %v27_v4 = vld [vmem:[#allocation2] sm:$0xff]  ;;  %s104_s11 = smov [#allocation5]   ;;  %s39_s15 = sshll.u32 %s122_s1, 4  ;;  %s40_s15 = int_to_ptr.hbm [resolvable:$true] %s39_s15 }
   0x6   :  { %s37_s12 = sshll.u32 %s104_s11, 4  ;;  %s38_s12 = int_to_ptr.vmem [resolvable:$true] %s37_s12 }
   0x7   :  { %v24_v1 = vand.u32 127, %v23_v0 }
   0x9   :  { %v25_v2 = vand.u32 7, %v24_v1 }
   0xb   :  { %v26_v3 = vsub.s32 7, %v25_v2 }
   0xd   :  { %v28_v5 = vshra.s32 %v27_v4, %v26_v3 }
   0xf   :  { %v29_v6 = vand.u32 1, %v28_v5 }
  0x11   :  { %v30_v7 = vcvt.s32.f32 %v29_v6 }
  0x13   :  { %31 = vst [vmem:[#allocation5] sm:$0xff] %v30_v7 }
  0x14   :  { %42 = dma.vmem_to_hbm [thread:$0]  %s38_s12, 128, %s40_s15, [#allocation4]  }
  0x15   :  { %101 = dma.done.wait [#allocation4], 128  }
  0x16   :  { %102 = vsyncadd [#allocation4], 4294967168 }
  0x17   :  { %47 = vsyncpa [#allocation3], 1 }
  0x18   :  { %48 = vsyncpa [#allocation4], 1 }

</bundles_post_ra>
